<compile_context>
chip_gen: v5e
topology: v5e:2x2
jax: 0.10.0
libtpu: 0.0.40
codegen_flags: <defaults>
</compile_context>

<pallas_src>
import jax
import jax.numpy as jnp
from jax.experimental import pallas as pl
from jax.experimental.pallas import tpu as pltpu

LANE = 128     # lane width: last dim of any block should be a multiple of this
SUBLANE = 8    # f32 sublane packing; batch tiles are multiples of this


def _round_up(x, m):
    return (x + m - 1) // m * m


def _pad_to(a, axis, target):
    pad = target - a.shape[axis]
    if pad <= 0:
        return a
    widths = [(0, 0)] * a.ndim
    widths[axis] = (0, pad)
    return jnp.pad(a, widths)


# ---------------------------------------------------------------------------
# Kernels
# ---------------------------------------------------------------------------
def _two_layer_kernel(x_ref, w1_ref, b1_ref, w2_ref, b2_ref, out_ref):
    """Two chained Linears on one batch tile; f32 accumulation on the MXU."""
    h = jnp.dot(x_ref[...], w1_ref[...], preferred_element_type=jnp.float32)
    h = (h + b1_ref[...]).astype(w2_ref.dtype)      # bias in f32, cast for the MXU
    y = jnp.dot(h, w2_ref[...], preferred_element_type=jnp.float32)
    out_ref[...] = (y + b2_ref[...]).astype(out_ref.dtype)


def _single_layer_kernel(x_ref, w_ref, b_ref, out_ref):
    """One Linear: either the algebraically folded (W1@W2) path or bneck=0."""
    y = jnp.dot(x_ref[...], w_ref[...], preferred_element_type=jnp.float32)
    out_ref[...] = (y + b_ref[...]).astype(out_ref.dtype)


# ---------------------------------------------------------------------------
# Hardware-aware sizing
# ---------------------------------------------------------------------------
def _vmem_budget_and_limit():
    """(scratch budget for sizing, vmem_limit_bytes) per TPU generation."""
    budget, limit = 20 << 20, 32 << 20                  # conservative default
    try:
        cap = int(getattr(pltpu.get_tpu_info(), "vmem_capacity_bytes", 0) or 0)
    except Exception:
        cap = 0
    if cap >= (96 << 20):
        budget, limit = 48 << 20, 64 << 20               # v5e / v6e: 128 MiB physical
    elif cap > 0:
        budget, limit = 24 << 20, 32 << 20               # v7x: 64 MiB physical
    return budget, limit


def _choose_block_b(B, per_row_bytes, resident_bytes, vmem_budget, cap=1024):
    """Largest sublane-aligned batch tile that fits the VMEM budget, capped so
    the grid has at least 2 steps (v7x megacore) when the batch allows it."""
    if B <= SUBLANE:
        return int(B)                                    # block == full batch dim
    avail = max(vmem_budget - resident_bytes, per_row_bytes * SUBLANE)
    tb = max(SUBLANE, (avail // max(per_row_bytes, 1)) // SUBLANE * SUBLANE)
    tb = min(tb, cap)
    tb = min(tb, _round_up(pl.cdiv(B, 2), SUBLANE))      # >= 2 grid steps for 2 TCs
    tb = min(tb, _round_up(B, SUBLANE))
    return int(tb)


# ---------------------------------------------------------------------------
# Parameter preparation (do this ONCE, outside the per-step forward)
# ---------------------------------------------------------------------------
def prepare_cls_copy_params(w1, b1, w2, b2, *, compute_dtype=jnp.bfloat16,
                            fuse_layers=None):
    """Fold (optionally), pad, and cast the CLS_copy weights.

    Pass w1=None, b1=None for the bottle_neck_dim=0 configuration (single Linear).
    `fuse_layers=None` auto-selects the folded single-matmul path whenever
    out_p <= bneck_p (fewer MXU passes, less VMEM residency)."""
    if w1 is None:                                       # bottle_neck_dim == 0
        in_dim, out_dim = w2.shape
        bneck = 0
        fuse = True
    else:
        in_dim, bneck = w1.shape
        out_dim = w2.shape[1]
        fuse = fuse_layers

    in_p = _round_up(in_dim, LANE)
    bneck_p = _round_up(bneck, LANE) if bneck else 0
    out_p = _round_up(out_dim, LANE)

    if fuse is None:
        fuse = out_p <= bneck_p

    if fuse:
        if w1 is None:
            w_f = w2.astype(jnp.float32)
            b_f = b2.astype(jnp.float32)
        else:
            # Exact fold: no BN / activation between the Linears in CLS_copy.forward.
            w_f = jnp.dot(w1.astype(jnp.float32), w2.astype(jnp.float32))
            b_f = jnp.dot(b1.astype(jnp.float32), w2.astype(jnp.float32)) + b2.astype(jnp.float32)
        # TODO(synk): optional float8_e4m3 weight cast for v7x once accuracy is validated.
        args = (
            _pad_to(_pad_to(w_f, 0, in_p), 1, out_p).astype(compute_dtype),
            _pad_to(b_f.reshape(1, -1), 1, out_p).astype(jnp.float32),
        )
        bneck_term = 0
    else:
        args = (
            _pad_to(_pad_to(w1, 0, in_p), 1, bneck_p).astype(compute_dtype),
            _pad_to(b1.reshape(1, -1), 1, bneck_p).astype(jnp.float32),
            _pad_to(_pad_to(w2, 0, bneck_p), 1, out_p).astype(compute_dtype),
            _pad_to(b2.reshape(1, -1), 1, out_p).astype(jnp.float32),
        )
        bneck_term = bneck_p

    return dict(fused=bool(fuse), args=args, in_dim=in_dim, in_p=in_p,
                bneck_p=bneck_term, out_dim=out_dim, out_p=out_p,
                compute_dtype=jnp.dtype(compute_dtype))


# ---------------------------------------------------------------------------
# Forward
# ---------------------------------------------------------------------------
def cls_copy_apply(x, params, *, block_b=None, single_buffer_weights=True):
    """logits = (x @ W1 + b1) @ W2 + b2 with pre-prepared (padded/folded) params."""
    assert x.ndim == 2, "expected (batch, in_dim) activations"
    B, in_dim = x.shape
    assert in_dim == params["in_dim"]

    in_p, out_p, bneck_p = params["in_p"], params["out_p"], params["bneck_p"]
    cdt = params["compute_dtype"]
    out_dtype = x.dtype
    args = params["args"]

    # Lane-dense LHS: cast to compute dtype and zero-pad the feature dim to a
    # lane multiple (the pad fuses with the cast; no batch-dim pad is done).
    xp = x.astype(cdt)
    if in_p != in_dim:
        xp = _pad_to(xp, 1, in_p)

    act_bytes = jnp.dtype(cdt).itemsize
    out_bytes = jnp.dtype(out_dtype).itemsize
    resident_bytes = sum(int(a.size) * a.dtype.itemsize for a in args)
    per_row_bytes = (2 * (in_p * act_bytes + out_p * out_bytes)   # dbl-buffered x/out tiles
                     + 4 * (bneck_p + out_p))                     # f32 intermediates
    vmem_budget, vmem_limit = _vmem_budget_and_limit()
    if block_b is None:
        nbuf = 1 if single_buffer_weights else 2
        block_b = _choose_block_b(B, per_row_bytes, nbuf * resident_bytes, vmem_budget)

    grid = (pl.cdiv(B, block_b),)   # ragged last tile handled by Pallas (OOB rows dropped)

    kernel = _single_layer_kernel if params["fused"] else _two_layer_kernel
    weight_shapes = [a.shape for a in args]

    if params["fused"]:
        flops = 2 * B * in_p * out_p
    else:
        flops = 2 * B * (in_p * bneck_p + bneck_p * out_p)
    cost = pl.CostEstimate(
        flops=flops, transcendentals=0,
        bytes_accessed=B * in_p * act_bytes + resident_bytes + B * out_p * out_bytes)

    def _weight_spec(shape, single):
        if single:
            # Constant index_map -> a second pipeline buffer is pure VMEM waste.
            return pl.BlockSpec(shape, lambda i: (0, 0), pipeline_mode=pl.Buffered(1))
        return pl.BlockSpec(shape, lambda i: (0, 0))

    def _call(single):
        return pl.pallas_call(
            kernel,
            out_shape=jax.ShapeDtypeStruct((B, out_p), out_dtype),
            grid=grid,
            in_specs=[pl.BlockSpec((block_b, in_p), lambda i: (i, 0))]
                     + [_weight_spec(s, single) for s in weight_shapes],
            out_specs=pl.BlockSpec((block_b, out_p), lambda i: (i, 0)),
            compiler_params=pltpu.CompilerParams(
                dimension_semantics=("parallel",),       # v7x megacore over batch tiles
                vmem_limit_bytes=vmem_limit,
            ),
            cost_estimate=cost,
        )(xp, *args)

    try:
        out_padded = _call(single_buffer_weights)
    except Exception:
        # Fallback for builds that reject pipeline_mode=pl.Buffered(1).
        out_padded = _call(False)

    return out_padded[:, :params["out_dim"]]


def cls_copy_forward(x, w1, b1, w2, b2, *, compute_dtype=jnp.bfloat16,
                     fuse_layers=None, block_b=None):
    """Convenience wrapper (prepares params on every call).  For repeated
    forwards, call prepare_cls_copy_params() once and use cls_copy_apply()."""
    params = prepare_cls_copy_params(w1, b1, w2, b2, compute_dtype=compute_dtype,
                                     fuse_layers=fuse_layers)
    return cls_copy_apply(x, params, block_b=block_b)


# ---------------------------------------------------------------------------
# Demo / correctness check
# ---------------------------------------------------------------------------
def init_params(key, in_dim, out_dim, bottle_neck_dim):
    """Deterministic init mimicking nn.Linear's U(-1/sqrt(fan_in), 1/sqrt(fan_in))."""
    k1, k2, k3, k4 = jax.random.split(key, 4)
    lim1 = 1.0 / jnp.sqrt(in_dim)
    lim2 = 1.0 / jnp.sqrt(bottle_neck_dim)
    w1 = jax.random.uniform(k1, (in_dim, bottle_neck_dim), jnp.float32, -lim1, lim1)
    b1 = jax.random.uniform(k2, (bottle_neck_dim,), jnp.float32, -lim1, lim1)
    w2 = jax.random.uniform(k3, (bottle_neck_dim, out_dim), jnp.float32, -lim2, lim2)
    b2 = jax.random.uniform(k4, (out_dim,), jnp.float32, -lim2, lim2)
    return w1, b1, w2, b2


if __name__ == "__main__":
    # Small shapes consistent with the module; batch not a multiple of 8 and
    # in_dim not a multiple of 128, to exercise the ragged-tile / lane-pad paths.
    B, IN_DIM, BOTTLENECK, OUT_DIM = 10, 32, 256, 16

    key = jax.random.PRNGKey(0)
    kx, kp = jax.random.split(key)
    x = jax.random.normal(kx, (B, IN_DIM), jnp.float32)
    w1, b1, w2, b2 = init_params(kp, IN_DIM, OUT_DIM, BOTTLENECK)

    y_ref = (x @ w1 + b1) @ w2 + b2

    # 1) default path: auto-fused single matmul, bf16 compute / f32 accumulate.
    y = jax.block_until_ready(cls_copy_forward(x, w1, b1, w2, b2))
    assert y.shape == (B, OUT_DIM)
    assert jnp.allclose(y, y_ref, atol=3e-2, rtol=3e-2)

    # 2) exact two-layer path, f32 compute.
    y_f32 = jax.block_until_ready(
        cls_copy_forward(x, w1, b1, w2, b2, compute_dtype=jnp.float32, fuse_layers=False))
    assert y_f32.shape == (B, OUT_DIM)
    assert jnp.allclose(y_f32, y_ref, atol=1e-5, rtol=1e-5)

    # 3) fused path, f32 compute (validates the algebraic W1@W2 fold).
    y_fused = jax.block_until_ready(
        cls_copy_forward(x, w1, b1, w2, b2, compute_dtype=jnp.float32, fuse_layers=True))
    assert jnp.allclose(y_fused, y_ref, atol=1e-4, rtol=1e-4)

    # 4) bottle_neck_dim == 0 configuration: a single Linear(in_dim, out_dim).
    lim = 1.0 / jnp.sqrt(IN_DIM)
    ks1, ks2 = jax.random.split(jax.random.PRNGKey(1))
    ws = jax.random.uniform(ks1, (IN_DIM, OUT_DIM), jnp.float32, -lim, lim)
    bs = jax.random.uniform(ks2, (OUT_DIM,), jnp.float32, -lim, lim)
    y_single = jax.block_until_ready(
        cls_copy_forward(x, None, None, ws, bs, compute_dtype=jnp.float32))
    assert jnp.allclose(y_single, x @ ws + bs, atol=1e-5, rtol=1e-5)

    # 5) prepared-params path (fold/pad/cast hoisted out of the forward).
    params = prepare_cls_copy_params(w1, b1, w2, b2)   # default bf16, auto-fused
    y_prep = jax.block_until_ready(cls_copy_apply(x, params))
    assert jnp.allclose(y_prep, y_ref, atol=3e-2, rtol=3e-2)

    print("KERNEL_OK")
</pallas_src>

<mosaic_0001>
module attributes {stable_mosaic.version = 11 : i64} {
  func.func @_single_layer_kernel(%arg0: i32, %arg1: memref<8x128xbf16, #tpu.memory_space<vmem>>, %arg2: memref<128x128xbf16, #tpu.memory_space<vmem>>, %arg3: memref<1x128xf32, #tpu.memory_space<vmem>>, %arg4: memref<8x128xf32, #tpu.memory_space<vmem>>) attributes {dimension_semantics = [#tpu.dimension_semantics<parallel>], iteration_bounds = array<i64: 2>, scalar_prefetch = 0 : i64, scratch_operands = 0 : i64, tpu.core_type = #tpu.core_type<tc>, window_params = [{transform_indices = @transform_0, window_bounds = array<i64: 8, 128>}, {pipeline_mode = #tpu.pipeline_mode<synchronous>, transform_indices = @transform_1, window_bounds = array<i64: 128, 128>}, {pipeline_mode = #tpu.pipeline_mode<synchronous>, transform_indices = @transform_2, window_bounds = array<i64: 1, 128>}, {transform_indices = @transform_3, window_bounds = array<i64: 8, 128>}]} {
    %c0 = arith.constant 0 : index
    %c0_0 = arith.constant 0 : index
    %0 = vector.load %arg1[%c0, %c0_0] : memref<8x128xbf16, #tpu.memory_space<vmem>>, vector<8x128xbf16>
    %c0_1 = arith.constant 0 : index
    %c0_2 = arith.constant 0 : index
    %1 = vector.load %arg2[%c0_1, %c0_2] : memref<128x128xbf16, #tpu.memory_space<vmem>>, vector<128x128xbf16>
    %cst = arith.constant dense<0.000000e+00> : vector<8x128xf32>
    %2 = tpu.matmul %0, %1, %cst {dimension_numbers = #tpu.dot_dimension_numbers<[1], [0], [0], [1], [0, 0, 1, 1], [], []>} : vector<8x128xbf16>, vector<128x128xbf16>, vector<8x128xf32> -> vector<8x128xf32>
    %c0_3 = arith.constant 0 : index
    %c0_4 = arith.constant 0 : index
    %3 = vector.load %arg3[%c0_3, %c0_4] : memref<1x128xf32, #tpu.memory_space<vmem>>, vector<1x128xf32>
    %4 = vector.broadcast %3 : vector<1x128xf32> to vector<8x128xf32>
    %5 = arith.addf %2, %4 : vector<8x128xf32>
    %c0_5 = arith.constant 0 : index
    %c0_6 = arith.constant 0 : index
    %6 = vector.load %arg4[%c0_5, %c0_6] : memref<8x128xf32, #tpu.memory_space<vmem>>, vector<8x128xf32>
    tpu.vector_store %arg4[%c0_5, %c0_6], %5 {strides = array<i32>} : memref<8x128xf32, #tpu.memory_space<vmem>>, vector<8x128xf32>,
    return
  }
  func.func @transform_0(%arg0: i32) -> (i32, i32) {
    %c0_i32 = arith.constant 0 : i32
    %c0_i32_0 = arith.constant 0 : i32
    return %arg0, %c0_i32 : i32, i32
  }
  func.func @transform_1(%arg0: i32) -> (i32, i32) {
    %c0_i32 = arith.constant 0 : i32
    %c0_i32_0 = arith.constant 0 : i32
    %c0_i32_1 = arith.constant 0 : i32
    return %c0_i32, %c0_i32_0 : i32, i32
  }
  func.func @transform_2(%arg0: i32) -> (i32, i32) {
    %c0_i32 = arith.constant 0 : i32
    %c0_i32_0 = arith.constant 0 : i32
    %c0_i32_1 = arith.constant 0 : i32
    return %c0_i32, %c0_i32_0 : i32, i32
  }
  func.func @transform_3(%arg0: i32) -> (i32, i32) {
    %c0_i32 = arith.constant 0 : i32
    %c0_i32_0 = arith.constant 0 : i32
    return %arg0, %c0_i32 : i32, i32
  }
}

module attributes {stable_mosaic.version = 11 : i64} {
  func.func @_single_layer_kernel(%arg0: i32, %arg1: memref<8x128xbf16, #tpu.memory_space<vmem>>, %arg2: memref<128x128xbf16, #tpu.memory_space<vmem>>, %arg3: memref<1x128xf32, #tpu.memory_space<vmem>>, %arg4: memref<8x128xf32, #tpu.memory_space<vmem>>) attributes {dimension_semantics = [#tpu.dimension_semantics<parallel>], iteration_bounds = array<i64: 2>, scalar_prefetch = 0 : i64, scratch_operands = 0 : i64, tpu.core_type = #tpu.core_type<tc>, window_params = [{transform_indices = @transform_0, window_bounds = array<i64: 8, 128>}, {pipeline_mode = #tpu.pipeline_mode<synchronous>, transform_indices = @transform_1, window_bounds = array<i64: 128, 128>}, {pipeline_mode = #tpu.pipeline_mode<synchronous>, transform_indices = @transform_2, window_bounds = array<i64: 1, 128>}, {transform_indices = @transform_3, window_bounds = array<i64: 8, 128>}]} {
    %c0 = arith.constant 0 : index
    %c0_0 = arith.constant 0 : index
    %0 = vector.load %arg1[%c0, %c0_0] : memref<8x128xbf16, #tpu.memory_space<vmem>>, vector<8x128xbf16>
    %c0_1 = arith.constant 0 : index
    %c0_2 = arith.constant 0 : index
    %1 = vector.load %arg2[%c0_1, %c0_2] : memref<128x128xbf16, #tpu.memory_space<vmem>>, vector<128x128xbf16>
    %cst = arith.constant dense<0.000000e+00> : vector<8x128xf32>
    %2 = tpu.matmul %0, %1, %cst {dimension_numbers = #tpu.dot_dimension_numbers<[1], [0], [0], [1], [0, 0, 1, 1], [], []>} : vector<8x128xbf16>, vector<128x128xbf16>, vector<8x128xf32> -> vector<8x128xf32>
    %c0_3 = arith.constant 0 : index
    %c0_4 = arith.constant 0 : index
    %3 = vector.load %arg3[%c0_3, %c0_4] : memref<1x128xf32, #tpu.memory_space<vmem>>, vector<1x128xf32>
    %4 = vector.broadcast %3 : vector<1x128xf32> to vector<8x128xf32>
    %5 = arith.addf %2, %4 : vector<8x128xf32>
    %c0_5 = arith.constant 0 : index
    %c0_6 = arith.constant 0 : index
    %6 = vector.load %arg4[%c0_5, %c0_6] : memref<8x128xf32, #tpu.memory_space<vmem>>, vector<8x128xf32>
    tpu.vector_store %arg4[%c0_5, %c0_6], %5 {strides = array<i32>} : memref<8x128xf32, #tpu.memory_space<vmem>>, vector<8x128xf32>,
    return
  }
  func.func @transform_0(%arg0: i32) -> (i32, i32) {
    %c0_i32 = arith.constant 0 : i32
    %c0_i32_0 = arith.constant 0 : i32
    return %arg0, %c0_i32 : i32, i32
  }
  func.func @transform_1(%arg0: i32) -> (i32, i32) {
    %c0_i32 = arith.constant 0 : i32
    %c0_i32_0 = arith.constant 0 : i32
    %c0_i32_1 = arith.constant 0 : i32
    return %c0_i32, %c0_i32_0 : i32, i32
  }
  func.func @transform_2(%arg0: i32) -> (i32, i32) {
    %c0_i32 = arith.constant 0 : i32
    %c0_i32_0 = arith.constant 0 : i32
    %c0_i32_1 = arith.constant 0 : i32
    return %c0_i32, %c0_i32_0 : i32, i32
  }
  func.func @transform_3(%arg0: i32) -> (i32, i32) {
    %c0_i32 = arith.constant 0 : i32
    %c0_i32_0 = arith.constant 0 : i32
    return %arg0, %c0_i32 : i32, i32
  }
}

</mosaic_0001>

<bundles_post_ra>
// kernel: tpu_custom_call.1
= control target key start
LH: loop header
LB: loop body
LE: loop exit
PB: predicated region body
PF: predicated region fallthrough
CT: control target
= control target key end

     0   :  { %8 = vsyncpa [#allocation3], 0  ;;  %s793_s0 = inlined_call_operand.hbm [shape: bf16[10,128], index: 0, kind: input, shape index: {}]   ;;  %s794_s1 = inlined_call_operand.hbm [shape: bf16[128,128], index: 1, kind: input, shape index: {}]   ;;  %s795_s2 = inlined_call_operand.vmem [shape: f32[1,128], index: 2, kind: input, shape index: {}]   ;;  %s796_s3 = inlined_call_operand.hbm [shape: f32[10,128], index: 3, kind: output, shape index: {}]  }
   0x1   :  { %10 = vsyncpa [#allocation3 + $0x1], 0 }
   0x2   :  { %11 = vsyncpa [#allocation6], 0 }
   0x3   :  { %12 = vsyncpa [#allocation4], 0 }
   0x4   :  { %14 = vsyncpa [#allocation4 + $0x1], 0  ;;  %s653_s12 = smov 0   ;;  %s655_s13 = smov 0  }
   0x5   :  { %s657_s14 = smov 0   ;;  %s659_s15 = smov 0  }
   0x6 LB: > { %s130_s18 = sshll.u32 %s794_s1, 4  ;;  %s677_s19 = sadd.s32 4294967295, %s628_s15   ;;  %s628_s15 = sphi %s659_s15, %s806_s15   ;;  %s624_s14 = sphi %s657_s14, %s805_s14   ;;  %s620_s13 = sphi %s655_s13, %s804_s13   ;;  %s616_s12 = sphi %s653_s12, %s803_s12   ;;  %s131_s18 = int_to_ptr.hbm [resolvable:$true] %s130_s18 }
   0x7   : > { %p385_p0 = scmp.ge.s32.totalorder %s628_s15, 1  ;;  %p41_p1 = scmp.eq.s32.totalorder %s677_s19, 0 }
   0x8   : > { %p119_p2 = scmp.lt.s32.totalorder %s628_s15, 3  ;;  %s630_s21 = smov [#allocation5]  }
   0x9   : > { %s132_s22 = sshll.u32 %s630_s21, 4  ;;  %s631_s23 = smov 64   ;;  %s133_s22 = int_to_ptr.vmem [resolvable:$true] %s132_s22 }
   0xa   : > { %p682_p3 = pnand %p385_p0, %p119_p2  ;;  %s632_s24 = smov 4  }
   0xb   : > { %s384_s25 = sadd.s32 4294967294, %s628_s15   ;;  %s693_s26 = sadd.s32 1, %s628_s15  }
   0xc   : > { %p446_p4 = pneg %p682_p3  ;;  %s27_s27 = sadd.s32 1, %s624_s14 }
   0xd   : > { %s24_s28 = ssub.s32 %s628_s15, %s693_s26  ;;  %p34_p7 = scmp.ne.s32.totalorder %s624_s14, %s620_s13 }
   0xe   : > { %p447_p6 = pnand %p446_p4, %p41_p1  ;;  %p25_p8 = scmp.eq.s32.totalorder %s24_s28, 0 }
   0xf   : > { %p35_p9 = scmp.eq.s32.totalorder %s628_s15, 0  ;;  %p40_p10 = scmp.ne.s32.totalorder %s620_s13, %s616_s12 }
  0x10   : > { %449 = dma.hbm_to_vmem [thread:$0]  (!%p447_p6), %s131_s18, 1024, %s133_s22, [#allocation6], %s631_s23, %s631_s23, %s632_s24  }
  0x11   : > { %p106_p11 = scmp.eq.s32.totalorder %s677_s19, 1  ;;  %p709_p12 = por %p41_p1, %p40_p10 }
  0x12   : > { %s705_s29 = scalar_select %p25_p8, %s624_s14, %s27_s27  }
  0x13   : > { %p713_p13 = por %p106_p11, %p34_p7  ;;  %p112_p0 = scmp.eq.s32.totalorder %s384_s25, 1 }
  0x14   : > { %p36_p2 = por %p35_p9, %p34_p7  ;;  %s149_s5 = sand.u32 1, %s624_s14  }
  0x15   : > { %p718_p4 = por %p112_p0, %p40_p10  ;;  %p459_p6 = scmp.lt.s32.totalorder %s628_s15, 2 }
  0x16   : > { %s388_s7 = sshll.u32 %s149_s5, 2  ;;  %s389_s8 = sshll.u32 %s628_s15, 2 }
  0x17   : > { %s157_s11 = scalar_lea.hbm %s793_s0, %s389_s8  ;;  %s153_s17 = scalar_lea.vmem [#allocation2], %s388_s7 }
  0x18   : > { %s159_s16 = sshll.u32 %s157_s11, 4  ;;  %s161_s18 = sshll.u32 %s153_s17, 4  ;;  %s160_s16 = int_to_ptr.hbm [resolvable:$true] %s159_s16  ;;  %s162_s18 = int_to_ptr.vmem [resolvable:$true] %s161_s18 }
  0x19   : > { %p727_p8 = pnand %p459_p6, %p36_p2  ;;  %s150_s22 = scalar_lea.sflag [#allocation3], %s149_s5 }
  0x1a   : > { %s528_s23 = sshra.s32 %s160_s16, 4  ;;  %s535_s28 = scalar_lea.hbm %s793_s0, 8  ;;  %s529_s23 = int_to_ptr.hbm [resolvable:$true] %s528_s23 }
  0x1b   : > { %s530_s24 = scalar_lea.hbm %s529_s23, 4  ;;  %p532_p9 = pneg %p727_p8 }
  0x1c   : > { %p531_p7 = scmp.ne.s32.totalorder %s529_s23, %s530_s24  ;;  %p536_p0 = scmp.lt.s32.totalorder %s529_s23, %s793_s0 }
  0x1d   : > { %p537_p2 = scmp.lt.s32.totalorder %s535_s28, %s530_s24 }
  0x1e   : > { %p533_p10 = pnand %p532_p9, %p531_p7 }
  0x1f   : > { %p538_p6 = por %p537_p2, %p536_p0 }
  0x20   : > { %p534_p11 = pneg %p533_p10 }
  0x22   : > { %p539_p5 = pnand %p538_p6, %p534_p11 }
  0x24   : > { %542 = shalt.err (!%p539_p5)
}
  0x25   : > { %453 = dma.hbm_to_vmem [thread:$0]  (!%p727_p8), %s160_s16, 64, %s162_s18, %s150_s22  }
  0x26   : > { %170 = sbr.rel (%p682_p3) target bundleno = 212 (0xd4), region = 32  ;;  %s744_s5 = sand.u32 (!%p682_p3), 1, %s620_s13  }
  0x27   : > { %s391_s9 = sshll.u32 (!%p682_p3), %s744_s5, 2  ;;  %s173_s10 = scalar_lea.sflag (!%p682_p3), [#allocation3], %s744_s5 }
  0x28   : > { %s176_s11 = scalar_lea.vmem (!%p682_p3), [#allocation2], %s391_s9 }
  0x2b   : > { %603 = dma.done.wait (%p709_p12), %s173_s10, 64  }
  0x2c   : > { %605 = vsyncadd (%p709_p12), %s173_s10, 4294967232 }
  0x2d   : > { %607 = dma.done.wait (%p41_p1), [#allocation6], 1024  }
  0x2e   : > { %609 = vsyncadd (%p41_p1), [#allocation6], 4294966272  ;;  %v437_v0 = vld [vmem:[#allocation5 + $0x38] sm:$0xff]  ;;  %v436_v1 = vld [vmem:[#allocation5 + $0x30] sm:$0xff]  ;;  %s427_s20 = sshll.u32 %s677_s19, 3  ;;  %s393_s30 = sshll.u32 %s744_s5, 3 }
  0x2f   : > { %274 = vmatpush.bf16.msra.mxu0 %v437_v0  ;;  %v435_v2 = vld [vmem:[#allocation5 + $0x28] sm:$0xff]  ;;  %v434_v3 = vld [vmem:[#allocation5 + $0x20] sm:$0xff]  ;;  %v433_v4 = vld [vmem:[#allocation5 + $0x18] sm:$0xff]  ;;  %s299_s18 = scalar_lea.hbm %s796_s3, %s427_s20  ;;  %s204_s23 = scalar_lea.vmem [#allocation7], %s393_s30 }
  0x30   : > { %v432_v5 = vld [vmem:[#allocation5 + $0x10] sm:$0xff]  ;;  %v431_v6 = vld [vmem:[#allocation5 + $0x8] sm:$0xff]  ;;  %v430_v7 = vld [vmem:[#allocation5] sm:$0xff]  ;;  %s301_s24 = sshll.u32 %s204_s23, 4  ;;  %s303_s25 = sshll.u32 %s299_s18, 4  ;;  %s302_s24 = int_to_ptr.vmem [resolvable:$true] %s301_s24  ;;  %s304_s25 = int_to_ptr.hbm [resolvable:$true] %s303_s25 }
  0x31   : > { %v205_v8 = vld [vmem:[%s176_s11] sm:$0xf]  ;;  %s289_s27 = scalar_lea.sflag [#allocation4], %s744_s5  ;;  %s572_s19 = sshra.s32 %s304_s25, 4  ;;  %s573_s19 = int_to_ptr.hbm [resolvable:$true] %s572_s19 }
  0x32   : > { %v497_v9 = vld [vmem:[%s795_s2] ss:$0 sm:$0xff]  ;;  %s574_s28 = scalar_lea.hbm %s573_s19, 8  ;;  %s578_s9 = scalar_lea.hbm %s796_s3, 16 }
  0x33   : > { %275 = vmatpush.bf16.msra.mxu0 %v436_v1  ;;  %p575_p1 = scmp.ne.s32.totalorder %s573_s19, %s574_s28  ;;  %p579_p12 = scmp.lt.s32.totalorder %s573_s19, %s796_s3 }
  0x34   : > { %p580_p8 = scmp.lt.s32.totalorder %s578_s9, %s574_s28 }
  0x35   : > { %p576_p3 = pnand %p575_p1, %p713_p13 }
  0x36   : > { %p581_p7 = por %p580_p8, %p579_p12 }
  0x37   : > { %276 = vmatpush.bf16.msra.mxu0 %v435_v2  ;;  %p577_p5 = pneg %p576_p3 }
  0x39   : > { %p582_p9 = pnand %p581_p7, %p577_p5 }
  0x3b   : > { %277 = vmatpush.bf16.msra.mxu0 %v434_v3 }
  0x3f   : > { %278 = vmatpush.bf16.msra.mxu0 %v433_v4 }
  0x43   : > { %279 = vmatpush.bf16.msra.mxu0 %v432_v5 }
  0x47   : > { %280 = vmatpush.bf16.msra.mxu0 %v431_v6 }
  0x4b   : > { %281 = vmatpush.bf16.msra.mxu0 %v430_v7 }
  0x4e   : > { %282 = vmatmul.bf16.vlgmr.msra.gmra.mxu0 %v205_v8 }
  0xcb   : > { %v283_v10 = vpop.f32.mrf.mxu0 }
  0xcc   : > { %v284_v11 = vadd.f32 %v497_v9, %v283_v10 }
  0xce   : > { %287 = vst [vmem:[%s204_s23] sm:$0xff] %v284_v11 }
  0xcf   : > { %585 = shalt.err (!%p582_p9)
}
  0xd0   : > { %444 = dma.vmem_to_hbm [thread:$0]  (%p713_p13), %s302_s24, 128, %s304_s25, %s289_s27  }
  0xd3   : > { %v285_v12 = vpop.f32.mrf.mxu0 }
  0xd4 PF: > { %s315_s5 = sand.u32 1, %s616_s12   ;;  %p802_p10 = scmp.ge.s32.totalorder %s628_s15, 2 }
  0xd5   : > { %s316_s20 = scalar_lea.sflag [#allocation4], %s315_s5 }
  0xd6   : > { %p455_p11 = pnand %p802_p10, %p718_p4 }
  0xd8   : > { %p456_p0 = pneg %p455_p11 }
  0xda   : > { %611 = dma.done.wait (%p456_p0), %s316_s20, 128  }
  0xdb   : > { %613 = vsyncadd (%p456_p0), %s316_s20, 4294967168  ;;  %p17_p2 = scmp.ge.s32.totalorder %s693_s26, 4   ;;  %s803_s12 = smov %s620_s13 }
  0xdc   : > { %s804_s13 = smov %s624_s14  ;;  %s805_s14 = smov %s705_s29 }
  0xdd   : > { %s806_s15 = smov %s693_s26  ;;  %19 = sbr.rel (!%p17_p2) target bundleno = 6 (0x6), region = 81 }
  0xe2   :  { %322 = vsyncpa [#allocation3], 1 }
  0xe3   :  { %324 = vsyncpa [#allocation3 + $0x1], 1 }
  0xe4   :  { %325 = vsyncpa [#allocation6], 1 }
  0xe5   :  { %326 = vsyncpa [#allocation4], 1 }
  0xe6   :  { %328 = vsyncpa [#allocation4 + $0x1], 1 }

// kernel: tpu_custom_call.1
= control target key start
LH: loop header
LB: loop body
LE: loop exit
PB: predicated region body
PF: predicated region fallthrough
CT: control target
= control target key end

     0   :  { %8 = vsyncpa [#allocation3], 0  ;;  %s793_s0 = inlined_call_operand.hbm [shape: bf16[10,128], index: 0, kind: input, shape index: {}]   ;;  %s794_s1 = inlined_call_operand.hbm [shape: bf16[128,128], index: 1, kind: input, shape index: {}]   ;;  %s795_s2 = inlined_call_operand.vmem [shape: f32[1,128], index: 2, kind: input, shape index: {}]   ;;  %s796_s3 = inlined_call_operand.hbm [shape: f32[10,128], index: 3, kind: output, shape index: {}]  }
   0x1   :  { %10 = vsyncpa [#allocation3 + $0x1], 0 }
   0x2   :  { %11 = vsyncpa [#allocation6], 0 }
   0x3   :  { %12 = vsyncpa [#allocation4], 0 }
   0x4   :  { %14 = vsyncpa [#allocation4 + $0x1], 0  ;;  %s653_s12 = smov 0   ;;  %s655_s13 = smov 0  }
   0x5   :  { %s657_s14 = smov 0   ;;  %s659_s15 = smov 0  }
   0x6 LB: > { %s130_s18 = sshll.u32 %s794_s1, 4  ;;  %s677_s19 = sadd.s32 4294967295, %s628_s15   ;;  %s628_s15 = sphi %s659_s15, %s806_s15   ;;  %s624_s14 = sphi %s657_s14, %s805_s14   ;;  %s620_s13 = sphi %s655_s13, %s804_s13   ;;  %s616_s12 = sphi %s653_s12, %s803_s12   ;;  %s131_s18 = int_to_ptr.hbm [resolvable:$true] %s130_s18 }
   0x7   : > { %p385_p0 = scmp.ge.s32.totalorder %s628_s15, 1  ;;  %p41_p1 = scmp.eq.s32.totalorder %s677_s19, 0 }
   0x8   : > { %p119_p2 = scmp.lt.s32.totalorder %s628_s15, 3  ;;  %s630_s21 = smov [#allocation5]  }
   0x9   : > { %s132_s22 = sshll.u32 %s630_s21, 4  ;;  %s631_s23 = smov 64   ;;  %s133_s22 = int_to_ptr.vmem [resolvable:$true] %s132_s22 }
   0xa   : > { %p682_p3 = pnand %p385_p0, %p119_p2  ;;  %s632_s24 = smov 4  }
   0xb   : > { %s384_s25 = sadd.s32 4294967294, %s628_s15   ;;  %s693_s26 = sadd.s32 1, %s628_s15  }
   0xc   : > { %p446_p4 = pneg %p682_p3  ;;  %s27_s27 = sadd.s32 1, %s624_s14 }
   0xd   : > { %s24_s28 = ssub.s32 %s628_s15, %s693_s26  ;;  %p34_p7 = scmp.ne.s32.totalorder %s624_s14, %s620_s13 }
   0xe   : > { %p447_p6 = pnand %p446_p4, %p41_p1  ;;  %p25_p8 = scmp.eq.s32.totalorder %s24_s28, 0 }
   0xf   : > { %p35_p9 = scmp.eq.s32.totalorder %s628_s15, 0  ;;  %p40_p10 = scmp.ne.s32.totalorder %s620_s13, %s616_s12 }
  0x10   : > { %449 = dma.hbm_to_vmem [thread:$0]  (!%p447_p6), %s131_s18, 1024, %s133_s22, [#allocation6], %s631_s23, %s631_s23, %s632_s24  }
  0x11   : > { %p106_p11 = scmp.eq.s32.totalorder %s677_s19, 1  ;;  %p709_p12 = por %p41_p1, %p40_p10 }
  0x12   : > { %s705_s29 = scalar_select %p25_p8, %s624_s14, %s27_s27  }
  0x13   : > { %p713_p13 = por %p106_p11, %p34_p7  ;;  %p112_p0 = scmp.eq.s32.totalorder %s384_s25, 1 }
  0x14   : > { %p36_p2 = por %p35_p9, %p34_p7  ;;  %s149_s5 = sand.u32 1, %s624_s14  }
  0x15   : > { %p718_p4 = por %p112_p0, %p40_p10  ;;  %p459_p6 = scmp.lt.s32.totalorder %s628_s15, 2 }
  0x16   : > { %s388_s7 = sshll.u32 %s149_s5, 2  ;;  %s389_s8 = sshll.u32 %s628_s15, 2 }
  0x17   : > { %s157_s11 = scalar_lea.hbm %s793_s0, %s389_s8  ;;  %s153_s17 = scalar_lea.vmem [#allocation2], %s388_s7 }
  0x18   : > { %s159_s16 = sshll.u32 %s157_s11, 4  ;;  %s161_s18 = sshll.u32 %s153_s17, 4  ;;  %s160_s16 = int_to_ptr.hbm [resolvable:$true] %s159_s16  ;;  %s162_s18 = int_to_ptr.vmem [resolvable:$true] %s161_s18 }
  0x19   : > { %p727_p8 = pnand %p459_p6, %p36_p2  ;;  %s150_s22 = scalar_lea.sflag [#allocation3], %s149_s5 }
  0x1a   : > { %s528_s23 = sshra.s32 %s160_s16, 4  ;;  %s535_s28 = scalar_lea.hbm %s793_s0, 8  ;;  %s529_s23 = int_to_ptr.hbm [resolvable:$true] %s528_s23 }
  0x1b   : > { %s530_s24 = scalar_lea.hbm %s529_s23, 4  ;;  %p532_p9 = pneg %p727_p8 }
  0x1c   : > { %p531_p7 = scmp.ne.s32.totalorder %s529_s23, %s530_s24  ;;  %p536_p0 = scmp.lt.s32.totalorder %s529_s23, %s793_s0 }
  0x1d   : > { %p537_p2 = scmp.lt.s32.totalorder %s535_s28, %s530_s24 }
  0x1e   : > { %p533_p10 = pnand %p532_p9, %p531_p7 }
  0x1f   : > { %p538_p6 = por %p537_p2, %p536_p0 }
  0x20   : > { %p534_p11 = pneg %p533_p10 }
  0x22   : > { %p539_p5 = pnand %p538_p6, %p534_p11 }
  0x24   : > { %542 = shalt.err (!%p539_p5)
}
  0x25   : > { %453 = dma.hbm_to_vmem [thread:$0]  (!%p727_p8), %s160_s16, 64, %s162_s18, %s150_s22  }
  0x26   : > { %170 = sbr.rel (%p682_p3) target bundleno = 212 (0xd4), region = 32  ;;  %s744_s5 = sand.u32 (!%p682_p3), 1, %s620_s13  }
  0x27   : > { %s391_s9 = sshll.u32 (!%p682_p3), %s744_s5, 2  ;;  %s173_s10 = scalar_lea.sflag (!%p682_p3), [#allocation3], %s744_s5 }
  0x28   : > { %s176_s11 = scalar_lea.vmem (!%p682_p3), [#allocation2], %s391_s9 }
  0x2b   : > { %603 = dma.done.wait (%p709_p12), %s173_s10, 64  }
  0x2c   : > { %605 = vsyncadd (%p709_p12), %s173_s10, 4294967232 }
  0x2d   : > { %607 = dma.done.wait (%p41_p1), [#allocation6], 1024  }
  0x2e   : > { %609 = vsyncadd (%p41_p1), [#allocation6], 4294966272  ;;  %v437_v0 = vld [vmem:[#allocation5 + $0x38] sm:$0xff]  ;;  %v436_v1 = vld [vmem:[#allocation5 + $0x30] sm:$0xff]  ;;  %s427_s20 = sshll.u32 %s677_s19, 3  ;;  %s393_s30 = sshll.u32 %s744_s5, 3 }
  0x2f   : > { %274 = vmatpush.bf16.msra.mxu0 %v437_v0  ;;  %v435_v2 = vld [vmem:[#allocation5 + $0x28] sm:$0xff]  ;;  %v434_v3 = vld [vmem:[#allocation5 + $0x20] sm:$0xff]  ;;  %v433_v4 = vld [vmem:[#allocation5 + $0x18] sm:$0xff]  ;;  %s299_s18 = scalar_lea.hbm %s796_s3, %s427_s20  ;;  %s204_s23 = scalar_lea.vmem [#allocation7], %s393_s30 }
  0x30   : > { %v432_v5 = vld [vmem:[#allocation5 + $0x10] sm:$0xff]  ;;  %v431_v6 = vld [vmem:[#allocation5 + $0x8] sm:$0xff]  ;;  %v430_v7 = vld [vmem:[#allocation5] sm:$0xff]  ;;  %s301_s24 = sshll.u32 %s204_s23, 4  ;;  %s303_s25 = sshll.u32 %s299_s18, 4  ;;  %s302_s24 = int_to_ptr.vmem [resolvable:$true] %s301_s24  ;;  %s304_s25 = int_to_ptr.hbm [resolvable:$true] %s303_s25 }
  0x31   : > { %v205_v8 = vld [vmem:[%s176_s11] sm:$0xf]  ;;  %s289_s27 = scalar_lea.sflag [#allocation4], %s744_s5  ;;  %s572_s19 = sshra.s32 %s304_s25, 4  ;;  %s573_s19 = int_to_ptr.hbm [resolvable:$true] %s572_s19 }
  0x32   : > { %v497_v9 = vld [vmem:[%s795_s2] ss:$0 sm:$0xff]  ;;  %s574_s28 = scalar_lea.hbm %s573_s19, 8  ;;  %s578_s9 = scalar_lea.hbm %s796_s3, 16 }
  0x33   : > { %275 = vmatpush.bf16.msra.mxu0 %v436_v1  ;;  %p575_p1 = scmp.ne.s32.totalorder %s573_s19, %s574_s28  ;;  %p579_p12 = scmp.lt.s32.totalorder %s573_s19, %s796_s3 }
  0x34   : > { %p580_p8 = scmp.lt.s32.totalorder %s578_s9, %s574_s28 }
  0x35   : > { %p576_p3 = pnand %p575_p1, %p713_p13 }
  0x36   : > { %p581_p7 = por %p580_p8, %p579_p12 }
  0x37   : > { %276 = vmatpush.bf16.msra.mxu0 %v435_v2  ;;  %p577_p5 = pneg %p576_p3 }
  0x39   : > { %p582_p9 = pnand %p581_p7, %p577_p5 }
  0x3b   : > { %277 = vmatpush.bf16.msra.mxu0 %v434_v3 }
  0x3f   : > { %278 = vmatpush.bf16.msra.mxu0 %v433_v4 }
  0x43   : > { %279 = vmatpush.bf16.msra.mxu0 %v432_v5 }
  0x47   : > { %280 = vmatpush.bf16.msra.mxu0 %v431_v6 }
  0x4b   : > { %281 = vmatpush.bf16.msra.mxu0 %v430_v7 }
  0x4e   : > { %282 = vmatmul.bf16.vlgmr.msra.gmra.mxu0 %v205_v8 }
  0xcb   : > { %v283_v10 = vpop.f32.mrf.mxu0 }
  0xcc   : > { %v284_v11 = vadd.f32 %v497_v9, %v283_v10 }
  0xce   : > { %287 = vst [vmem:[%s204_s23] sm:$0xff] %v284_v11 }
  0xcf   : > { %585 = shalt.err (!%p582_p9)
}
  0xd0   : > { %444 = dma.vmem_to_hbm [thread:$0]  (%p713_p13), %s302_s24, 128, %s304_s25, %s289_s27  }
  0xd3   : > { %v285_v12 = vpop.f32.mrf.mxu0 }
  0xd4 PF: > { %s315_s5 = sand.u32 1, %s616_s12   ;;  %p802_p10 = scmp.ge.s32.totalorder %s628_s15, 2 }
  0xd5   : > { %s316_s20 = scalar_lea.sflag [#allocation4], %s315_s5 }
  0xd6   : > { %p455_p11 = pnand %p802_p10, %p718_p4 }
  0xd8   : > { %p456_p0 = pneg %p455_p11 }
  0xda   : > { %611 = dma.done.wait (%p456_p0), %s316_s20, 128  }
  0xdb   : > { %613 = vsyncadd (%p456_p0), %s316_s20, 4294967168  ;;  %p17_p2 = scmp.ge.s32.totalorder %s693_s26, 4   ;;  %s803_s12 = smov %s620_s13 }
  0xdc   : > { %s804_s13 = smov %s624_s14  ;;  %s805_s14 = smov %s705_s29 }
  0xdd   : > { %s806_s15 = smov %s693_s26  ;;  %19 = sbr.rel (!%p17_p2) target bundleno = 6 (0x6), region = 81 }
  0xe2   :  { %322 = vsyncpa [#allocation3], 1 }
  0xe3   :  { %324 = vsyncpa [#allocation3 + $0x1], 1 }
  0xe4   :  { %325 = vsyncpa [#allocation6], 1 }
  0xe5   :  { %326 = vsyncpa [#allocation4], 1 }
  0xe6   :  { %328 = vsyncpa [#allocation4 + $0x1], 1 }

</bundles_post_ra>
